<compile_context>
chip_gen: v5e
topology: v5e:2x2
jax: 0.10.0
libtpu: 0.0.40
codegen_flags: <defaults>
</compile_context>

<pallas_src>
import jax
import jax.numpy as jnp
from jax.experimental import pallas as pl
from jax.experimental.pallas import tpu as pltpu

IN_RAW, H0, H1, H2_RAW, OUT_DIM = 13, 32, 64, 10, 1
IN_PAD, H2_PAD = 16, 16          # lane/sublane-friendly padded feature dims
LANE = 128
DEFAULT_TILE_B = 32768           # multiple of 128; ~2.5 MiB double-buffered VMEM
MAX_TILE_B = 65536               # hard cap: < 5 MiB double-buffered, safe on all gens


def _round_up(n, m):
    return ((n + m - 1) // m) * m


def _cdiv(a, b):
    return -(-a // b)


def _choose_tiling(batch, tile_b_req):
    """Pick (tile_b, b_pad): tile_b a multiple of 128, >= 2 grid steps when the padded
    batch allows (v7x megacore), and tiles sized to minimize batch padding."""
    b_unit = _round_up(max(batch, 1), LANE)
    tile_b_req = max(LANE, (int(tile_b_req) // LANE) * LANE)
    tile_b_req = min(tile_b_req, MAX_TILE_B)
    steps = _cdiv(b_unit, tile_b_req)
    if b_unit >= 2 * LANE:
        steps = max(steps, 2)                     # keep both TensorCores busy on v7x
    tile_b = _round_up(_cdiv(b_unit, steps), LANE)
    b_pad = tile_b * _cdiv(b_unit, tile_b)
    return tile_b, b_pad


def _mlp_kernel(x_ref,
                w0_ref, b0_ref,
                w1_ref, b1_ref,
                w2_ref, b2_ref,
                w3_ref, b3_ref,
                out_ref):
    # Batch-major activations: (tile_b, features).  bf16 MXU operands, f32 accumulate.
    h = x_ref[...]                                                        # (TB, 16) bf16

    # Layer 0: (TB,16) @ (16,32) -> (TB,32)
    h = jnp.dot(h, w0_ref[...], preferred_element_type=jnp.float32) + b0_ref[...]
    h = jnp.maximum(h, 0.0).astype(jnp.bfloat16)

    # Layer 1: (TB,32) @ (32,64) -> (TB,64)
    h = jnp.dot(h, w1_ref[...], preferred_element_type=jnp.float32) + b1_ref[...]
    h = jnp.maximum(h, 0.0).astype(jnp.bfloat16)

    # Layer 2: (TB,64) @ (64,16) -> (TB,16)   (cols 10..15 are zero padding)
    h = jnp.dot(h, w2_ref[...], preferred_element_type=jnp.float32) + b2_ref[...]
    h = jnp.maximum(h, 0.0).astype(jnp.bfloat16)

    # Output layer, lane-dense: contract feature dims of (1,16) and (TB,16) -> (1, TB).
    y = jax.lax.dot_general(w3_ref[...], h,
                            dimension_numbers=(((1,), (1,)), ((), ())),
                            preferred_element_type=jnp.float32)
    out_ref[...] = y + b3_ref[...]                                        # (1, TB) f32


def _resident_spec(a):
    """Full-array block, same block index every grid step -> stays VMEM-resident."""
    n = a.ndim
    return pl.BlockSpec(a.shape, lambda i: (0,) * n)


def the_net_forward(x, params, *, tile_b=DEFAULT_TILE_B):
    """x: (B, 13) float32.  params: pre-padded / pre-cast dict (see init_params)."""
    B, F = x.shape
    tile_b, b_pad = _choose_tiling(B, tile_b)

    # Single fused pad+cast pass; x stays batch-major (no transpose, no f32 round-trip).
    x_p = jnp.pad(x.astype(jnp.bfloat16), ((0, b_pad - B), (0, IN_PAD - F)))

    operands = (
        x_p,
        params["w0"], params["b0"],
        params["w1"], params["b1"],
        params["w2"], params["b2"],
        params["w3"], params["b3"],
    )

    grid = (b_pad // tile_b,)
    flops = 2 * (IN_PAD * H0 + H0 * H1 + H1 * H2_PAD + H2_PAD * OUT_DIM) * b_pad
    bytes_accessed = b_pad * (IN_PAD * 2 + 4) + 16 * 1024  # x(bf16) + out(f32) + weights

    y = pl.pallas_call(
        _mlp_kernel,
        out_shape=jax.ShapeDtypeStruct((1, b_pad), jnp.float32),
        grid=grid,
        in_specs=[pl.BlockSpec((tile_b, IN_PAD), lambda i: (i, 0))]       # x: batch-tiled
                 + [_resident_spec(a) for a in operands[1:]],             # weights: resident
        out_specs=pl.BlockSpec((1, tile_b), lambda i: (0, i)),            # lane-dense output
        compiler_params=pltpu.CompilerParams(
            dimension_semantics=("parallel",)),                           # megacore on v7x
        cost_estimate=pl.CostEstimate(flops=flops, transcendentals=0,
                                      bytes_accessed=bytes_accessed),
    )(*operands)

    return y[:, :B].T                                                     # (B, 1) f32


def init_params(key):
    """Deterministic init matching nn.Linear defaults.  Hidden-layer weights stored
    transposed (in, out) for batch-major matmuls; output-layer weight kept (out, in) for
    the lane-dense final contraction.  All weights zero-padded to lane-friendly dims and
    cast to bf16; biases are (1, out) f32."""
    dims = [(IN_RAW, H0), (H0, H1), (H1, H2_RAW), (H2_RAW, OUT_DIM)]
    pad_in = [IN_PAD, H0, H1, H2_PAD]
    pad_out = [H0, H1, H2_PAD, OUT_DIM]
    params = {}
    for i, (fan_in, fan_out) in enumerate(dims):
        key, kw, kb = jax.random.split(key, 3)
        bound = 1.0 / jnp.sqrt(float(fan_in))  # PyTorch default uniform bound
        w = jax.random.uniform(kw, (fan_out, fan_in), jnp.float32, -bound, bound)
        b = jax.random.uniform(kb, (fan_out,), jnp.float32, -bound, bound)
        if i < 3:
            wp = (jnp.zeros((pad_in[i], pad_out[i]), jnp.float32)
                  .at[:fan_in, :fan_out].set(w.T))
        else:
            wp = (jnp.zeros((pad_out[i], pad_in[i]), jnp.float32)
                  .at[:fan_out, :fan_in].set(w))
        bp = jnp.zeros((1, pad_out[i]), jnp.float32).at[0, :fan_out].set(b)
        params[f"w{i}"] = wp.astype(jnp.bfloat16)
        params[f"b{i}"] = bp
    return params


def reference_forward(x, params):
    """Pure-JAX reference using the SAME bf16-quantized operands as the kernel."""
    B, F = x.shape
    h = jnp.pad(x, ((0, 0), (0, IN_PAD - F)))
    h = h.astype(jnp.bfloat16).astype(jnp.float32)
    for i in range(3):
        w = params[f"w{i}"].astype(jnp.float32)       # (in_pad, out_pad)
        h = jnp.maximum(h @ w + params[f"b{i}"], 0.0)
        h = h.astype(jnp.bfloat16).astype(jnp.float32)
    w3 = params["w3"].astype(jnp.float32)             # (1, 16)
    return h @ w3.T + params["b3"]                    # (B, 1)


if __name__ == "__main__":
    key = jax.random.PRNGKey(0)
    key, kx = jax.random.split(key)
    params = init_params(key)

    # Small batch (single grid step) and a batch that exercises the >=2-step parallel grid.
    for batch in (8, 300):
        x = jax.random.normal(jax.random.fold_in(kx, batch), (batch, IN_RAW),
                              dtype=jnp.float32)
        out = jax.block_until_ready(the_net_forward(x, params))
        ref = reference_forward(x, params)
        assert out.shape == (batch, 1), out.shape
        assert jnp.allclose(out, ref, atol=2e-3, rtol=2e-3), (out, ref)

    print("KERNEL_OK")
</pallas_src>

<mosaic_0001>
module attributes {stable_mosaic.version = 11 : i64} {
  func.func @_mlp_kernel(%arg0: i32, %arg1: memref<128x16xbf16, #tpu.memory_space<vmem>>, %arg2: memref<16x32xbf16, #tpu.memory_space<vmem>>, %arg3: memref<1x32xf32, #tpu.memory_space<vmem>>, %arg4: memref<32x64xbf16, #tpu.memory_space<vmem>>, %arg5: memref<1x64xf32, #tpu.memory_space<vmem>>, %arg6: memref<64x16xbf16, #tpu.memory_space<vmem>>, %arg7: memref<1x16xf32, #tpu.memory_space<vmem>>, %arg8: memref<1x16xbf16, #tpu.memory_space<vmem>>, %arg9: memref<1x1xf32, #tpu.memory_space<vmem>>, %arg10: memref<1x128xf32, #tpu.memory_space<vmem>>) attributes {dimension_semantics = [#tpu.dimension_semantics<parallel>], iteration_bounds = array<i64: 1>, scalar_prefetch = 0 : i64, scratch_operands = 0 : i64, tpu.core_type = #tpu.core_type<tc>, window_params = [{transform_indices = @transform_0, window_bounds = array<i64: 128, 16>}, {pipeline_mode = #tpu.pipeline_mode<synchronous>, transform_indices = @transform_1, window_bounds = array<i64: 16, 32>}, {pipeline_mode = #tpu.pipeline_mode<synchronous>, transform_indices = @transform_2, window_bounds = array<i64: 1, 32>}, {pipeline_mode = #tpu.pipeline_mode<synchronous>, transform_indices = @transform_3, window_bounds = array<i64: 32, 64>}, {pipeline_mode = #tpu.pipeline_mode<synchronous>, transform_indices = @transform_4, window_bounds = array<i64: 1, 64>}, {pipeline_mode = #tpu.pipeline_mode<synchronous>, transform_indices = @transform_5, window_bounds = array<i64: 64, 16>}, {pipeline_mode = #tpu.pipeline_mode<synchronous>, transform_indices = @transform_6, window_bounds = array<i64: 1, 16>}, {pipeline_mode = #tpu.pipeline_mode<synchronous>, transform_indices = @transform_7, window_bounds = array<i64: 1, 16>}, {pipeline_mode = #tpu.pipeline_mode<synchronous>, transform_indices = @transform_8, window_bounds = array<i64: 1, 1>}, {transform_indices = @transform_9, window_bounds = array<i64: 1, 128>}]} {
    %c0 = arith.constant 0 : index
    %c0_0 = arith.constant 0 : index
    %0 = vector.load %arg1[%c0, %c0_0] : memref<128x16xbf16, #tpu.memory_space<vmem>>, vector<128x16xbf16>
    %c0_1 = arith.constant 0 : index
    %c0_2 = arith.constant 0 : index
    %1 = vector.load %arg2[%c0_1, %c0_2] : memref<16x32xbf16, #tpu.memory_space<vmem>>, vector<16x32xbf16>
    %cst = arith.constant dense<0.000000e+00> : vector<128x32xf32>
    %2 = tpu.matmul %0, %1, %cst {dimension_numbers = #tpu.dot_dimension_numbers<[1], [0], [0], [1], [0, 0, 1, 1], [], []>} : vector<128x16xbf16>, vector<16x32xbf16>, vector<128x32xf32> -> vector<128x32xf32>
    %c0_3 = arith.constant 0 : index
    %c0_4 = arith.constant 0 : index
    %3 = vector.load %arg3[%c0_3, %c0_4] : memref<1x32xf32, #tpu.memory_space<vmem>>, vector<1x32xf32>
    %4 = vector.broadcast %3 : vector<1x32xf32> to vector<128x32xf32>
    %5 = arith.addf %2, %4 : vector<128x32xf32>
    %cst_5 = arith.constant 0.000000e+00 : f32
    %6 = vector.broadcast %cst_5 : f32 to vector<128x32xf32>
    %7 = arith.maximumf %5, %6 : vector<128x32xf32>
    %8 = arith.truncf %7 : vector<128x32xf32> to vector<128x32xbf16>
    %c0_6 = arith.constant 0 : index
    %c0_7 = arith.constant 0 : index
    %9 = vector.load %arg4[%c0_6, %c0_7] : memref<32x64xbf16, #tpu.memory_space<vmem>>, vector<32x64xbf16>
    %cst_8 = arith.constant dense<0.000000e+00> : vector<128x64xf32>
    %10 = tpu.matmul %8, %9, %cst_8 {dimension_numbers = #tpu.dot_dimension_numbers<[1], [0], [0], [1], [0, 0, 1, 1], [], []>} : vector<128x32xbf16>, vector<32x64xbf16>, vector<128x64xf32> -> vector<128x64xf32>
    %c0_9 = arith.constant 0 : index
    %c0_10 = arith.constant 0 : index
    %11 = vector.load %arg5[%c0_9, %c0_10] : memref<1x64xf32, #tpu.memory_space<vmem>>, vector<1x64xf32>
    %12 = vector.broadcast %11 : vector<1x64xf32> to vector<128x64xf32>
    %13 = arith.addf %10, %12 : vector<128x64xf32>
    %cst_11 = arith.constant 0.000000e+00 : f32
    %14 = vector.broadcast %cst_11 : f32 to vector<128x64xf32>
    %15 = arith.maximumf %13, %14 : vector<128x64xf32>
    %16 = arith.truncf %15 : vector<128x64xf32> to vector<128x64xbf16>
    %c0_12 = arith.constant 0 : index
    %c0_13 = arith.constant 0 : index
    %17 = vector.load %arg6[%c0_12, %c0_13] : memref<64x16xbf16, #tpu.memory_space<vmem>>, vector<64x16xbf16>
    %cst_14 = arith.constant dense<0.000000e+00> : vector<128x16xf32>
    %18 = tpu.matmul %16, %17, %cst_14 {dimension_numbers = #tpu.dot_dimension_numbers<[1], [0], [0], [1], [0, 0, 1, 1], [], []>} : vector<128x64xbf16>, vector<64x16xbf16>, vector<128x16xf32> -> vector<128x16xf32>
    %c0_15 = arith.constant 0 : index
    %c0_16 = arith.constant 0 : index
    %19 = vector.load %arg7[%c0_15, %c0_16] : memref<1x16xf32, #tpu.memory_space<vmem>>, vector<1x16xf32>
    %20 = vector.broadcast %19 : vector<1x16xf32> to vector<128x16xf32>
    %21 = arith.addf %18, %20 : vector<128x16xf32>
    %cst_17 = arith.constant 0.000000e+00 : f32
    %22 = vector.broadcast %cst_17 : f32 to vector<128x16xf32>
    %23 = arith.maximumf %21, %22 : vector<128x16xf32>
    %24 = arith.truncf %23 : vector<128x16xf32> to vector<128x16xbf16>
    %c0_18 = arith.constant 0 : index
    %c0_19 = arith.constant 0 : index
    %25 = vector.load %arg8[%c0_18, %c0_19] : memref<1x16xbf16, #tpu.memory_space<vmem>>, vector<1x16xbf16>
    %cst_20 = arith.constant dense<0.000000e+00> : vector<1x128xf32>
    %26 = tpu.matmul %25, %24, %cst_20 {dimension_numbers = #tpu.dot_dimension_numbers<[1], [1], [0], [0], [0, 0, 1, 0], [], []>} : vector<1x16xbf16>, vector<128x16xbf16>, vector<1x128xf32> -> vector<1x128xf32>
    %c0_21 = arith.constant 0 : index
    %c0_22 = arith.constant 0 : index
    %27 = vector.load %arg9[%c0_21, %c0_22] : memref<1x1xf32, #tpu.memory_space<vmem>>, vector<1x1xf32>
    %28 = vector.broadcast %27 : vector<1x1xf32> to vector<1x128xf32>
    %29 = arith.addf %26, %28 : vector<1x128xf32>
    %c0_23 = arith.constant 0 : index
    %c0_24 = arith.constant 0 : index
    %30 = vector.load %arg10[%c0_23, %c0_24] : memref<1x128xf32, #tpu.memory_space<vmem>>, vector<1x128xf32>
    tpu.vector_store %arg10[%c0_23, %c0_24], %29 {strides = array<i32>} : memref<1x128xf32, #tpu.memory_space<vmem>>, vector<1x128xf32>,
    return
  }
  func.func @transform_0(%arg0: i32) -> (i32, i32) {
    %c0_i32 = arith.constant 0 : i32
    %c0_i32_0 = arith.constant 0 : i32
    return %arg0, %c0_i32 : i32, i32
  }
  func.func @transform_1(%arg0: i32) -> (i32, i32) {
    %c0_i32 = arith.constant 0 : i32
    %c0_i32_0 = arith.constant 0 : i32
    %c0_i32_1 = arith.constant 0 : i32
    return %c0_i32, %c0_i32_0 : i32, i32
  }
  func.func @transform_2(%arg0: i32) -> (i32, i32) {
    %c0_i32 = arith.constant 0 : i32
    %c0_i32_0 = arith.constant 0 : i32
    %c0_i32_1 = arith.constant 0 : i32
    return %c0_i32, %c0_i32_0 : i32, i32
  }
  func.func @transform_3(%arg0: i32) -> (i32, i32) {
    %c0_i32 = arith.constant 0 : i32
    %c0_i32_0 = arith.constant 0 : i32
    %c0_i32_1 = arith.constant 0 : i32
    return %c0_i32, %c0_i32_0 : i32, i32
  }
  func.func @transform_4(%arg0: i32) -> (i32, i32) {
    %c0_i32 = arith.constant 0 : i32
    %c0_i32_0 = arith.constant 0 : i32
    %c0_i32_1 = arith.constant 0 : i32
    return %c0_i32, %c0_i32_0 : i32, i32
  }
  func.func @transform_5(%arg0: i32) -> (i32, i32) {
    %c0_i32 = arith.constant 0 : i32
    %c0_i32_0 = arith.constant 0 : i32
    %c0_i32_1 = arith.constant 0 : i32
    return %c0_i32, %c0_i32_0 : i32, i32
  }
  func.func @transform_6(%arg0: i32) -> (i32, i32) {
    %c0_i32 = arith.constant 0 : i32
    %c0_i32_0 = arith.constant 0 : i32
    %c0_i32_1 = arith.constant 0 : i32
    return %c0_i32, %c0_i32_0 : i32, i32
  }
  func.func @transform_7(%arg0: i32) -> (i32, i32) {
    %c0_i32 = arith.constant 0 : i32
    %c0_i32_0 = arith.constant 0 : i32
    %c0_i32_1 = arith.constant 0 : i32
    return %c0_i32, %c0_i32_0 : i32, i32
  }
  func.func @transform_8(%arg0: i32) -> (i32, i32) {
    %c0_i32 = arith.constant 0 : i32
    %c0_i32_0 = arith.constant 0 : i32
    %c0_i32_1 = arith.constant 0 : i32
    return %c0_i32, %c0_i32_0 : i32, i32
  }
  func.func @transform_9(%arg0: i32) -> (i32, i32) {
    %c0_i32 = arith.constant 0 : i32
    %c0_i32_0 = arith.constant 0 : i32
    return %c0_i32, %arg0 : i32, i32
  }
}

</mosaic_0001>

<bundles_post_ra>
// kernel: tpu_custom_call.1
= control target key start
LH: loop header
LB: loop body
LE: loop exit
PB: predicated region body
PF: predicated region fallthrough
CT: control target
= control target key end

     0   :  { %s820_s0 = inlined_call_operand.vmem [shape: bf16[128,16], index: 0, kind: input, shape index: {}]   ;;  %s821_s1 = inlined_call_operand.vmem [shape: bf16[16,32], index: 1, kind: input, shape index: {}]   ;;  %s822_s2 = inlined_call_operand.vmem [shape: f32[1,32], index: 2, kind: input, shape index: {}]   ;;  %s823_s3 = inlined_call_operand.vmem [shape: bf16[32,64], index: 3, kind: input, shape index: {}]   ;;  %s824_s4 = inlined_call_operand.vmem [shape: f32[1,64], index: 4, kind: input, shape index: {}]   ;;  %s825_s5 = inlined_call_operand.vmem [shape: bf16[64,16], index: 5, kind: input, shape index: {}]   ;;  %s826_s6 = inlined_call_operand.vmem [shape: f32[1,16], index: 6, kind: input, shape index: {}]   ;;  %s827_s7 = inlined_call_operand.vmem [shape: bf16[1,16], index: 7, kind: input, shape index: {}]   ;;  %s828_s8 = inlined_call_operand.<no memory space> [shape: f32[1,1], index: 8, kind: input, shape index: {}]   ;;  %s829_s9 = inlined_call_operand.hbm [shape: f32[1,128], index: 9, kind: output, shape index: {}]  }
   0x1   :  { %v14_v0 = vstv %s828_s8 }
   0x2   :  { %15 = vst [vmem:[#allocation2] sm:$0x1] %v14_v0 }
   0x3   :  { %v612_v1 = vld [vmem:[%s821_s1] sm:$0xff]  ;;  %vm104_vm0 = vcmask 130048  }
   0x4   :  { %v604_v2 = vld [vmem:[%s820_s0] sm:$0xff]  ;;  %136 = vmatpush.bf16.msra.mxu0 %v612_v1 }
   0x5   :  { %16 = vsyncpa [#allocation4], 0  ;;  %v605_v3 = vld [vmem:[%s820_s0 + $0x8] sm:$0xff]  ;;  %v606_v4 = vld [vmem:[%s820_s0 + $0x10] sm:$0xff]  ;;  %vm222_vm1 = vcmask 261120   ;;  %vm356_vm2 = vcmask 523264  }
   0x6   :  { %v607_v5 = vld [vmem:[%s820_s0 + $0x18] sm:$0xff]  ;;  %v608_v6 = vld [vmem:[%s820_s0 + $0x20] sm:$0xff]  ;;  %v609_v7 = vld [vmem:[%s820_s0 + $0x28] sm:$0xff]  ;;  %s652_s18 = smov [#allocation3]   ;;  %s510_s22 = sshll.u32 %s829_s9, 4  ;;  %s511_s22 = int_to_ptr.hbm [resolvable:$true] %s510_s22 }
   0x7   :  { %555 = vmatmul.msk.bf16.vlgmr.msra.gmra.mxu0 %vm104_vm0, %v604_v2  ;;  %v610_v8 = vld [vmem:[%s820_s0 + $0x30] sm:$0xff]  ;;  %v614_v9 = vld [vmem:[%s823_s3 + $0x8] sm:$0xff]  ;;  %v613_v10 = vld [vmem:[%s823_s3] sm:$0xff]  ;;  %s508_s19 = sshll.u32 %s652_s18, 4  ;;  %s509_s19 = int_to_ptr.vmem [resolvable:$true] %s508_s19 }
   0x8   :  { %253 = vmatpush.bf16.msra.mxu1 %v614_v9  ;;  %v611_v11 = vld [vmem:[%s820_s0 + $0x38] sm:$0xff]  ;;  %v750_v13 = vld [vmem:[%s822_s2] ss:$0 sm:$0xff]  ;;  %v617_v63 = vld [vmem:[%s825_s5 + $0x10] sm:$0xff] }
   0x9   :  { %v618_v59 = vld [vmem:[%s825_s5 + $0x18] sm:$0xff]  ;;  %v616_v1 = vld [vmem:[%s825_s5 + $0x8] sm:$0xff]  ;;  %v615_v2 = vld [vmem:[%s825_s5] sm:$0xff] }
   0xa   :  { %385 = vmatpush.bf16.msra.mxu2 %v618_v59 }
   0xc   :  { %254 = vmatpush.bf16.msra.mxu1 %v613_v10  ;;  %v623_v10 = vld [vmem:[%s824_s4] ss:$0 sm:$0xff] }
   0xe   :  { %386 = vmatpush.bf16.msra.mxu2 %v617_v63 }
  0x12   :  { %387 = vmatpush.bf16.msra.mxu2 %v616_v1 }
  0x16   :  { %388 = vmatpush.bf16.msra.mxu2 %v615_v2 }
  0x17   :  { %556 = vmatmul.msk.bf16.gmra.mxu0 %vm104_vm0, %v605_v3 }
  0x27   :  { %557 = vmatmul.msk.bf16.gmra.mxu0 %vm104_vm0, %v606_v4 }
  0x37   :  { %558 = vmatmul.msk.bf16.gmra.mxu0 %vm104_vm0, %v607_v5 }
  0x47   :  { %559 = vmatmul.msk.bf16.gmra.mxu0 %vm104_vm0, %v608_v6 }
  0x57   :  { %560 = vmatmul.msk.bf16.gmra.mxu0 %vm104_vm0, %v609_v7 }
  0x67   :  { %561 = vmatmul.msk.bf16.gmra.mxu0 %vm104_vm0, %v610_v8 }
  0x77   :  { %562 = vmatmul.msk.bf16.gmra.mxu0 %vm104_vm0, %v611_v11 }
  0x84   :  { %v138_v12 = vpop.f32.mrf.mxu0 }
  0x85   :  { %v139_v14 = vadd.f32 %v750_v13, %v138_v12 }
  0x87   :  { %v178_v17 = vmax.f32 %v139_v14, 0.0 }
  0x8c   :  { %v140_v15 = vpop.f32.mrf.mxu0 }
  0x8d   :  { %v141_v16 = vadd.f32 %v750_v13, %v140_v15 }
  0x8f   :  { %v179_v18 = vmax.f32 %v141_v16, 0.0 }
  0x91   :  { %v194_v19 = vpack.c.bf16 %v179_v18, %v178_v17 }
  0x93   :  { %571 = vmatmul.msk.bf16.vlgmr.msra.gmra.mxu1 %vm222_vm1, %v194_v19 }
  0x94   :  { %v143_v20 = vpop.f32.mrf.mxu0 }
  0x95   :  { %v144_v21 = vadd.f32 %v750_v13, %v143_v20 }
  0x97   :  { %v180_v24 = vmax.f32 %v144_v21, 0.0 }
  0x9c   :  { %v145_v22 = vpop.f32.mrf.mxu0 }
  0x9d   :  { %v146_v23 = vadd.f32 %v750_v13, %v145_v22 }
  0x9f   :  { %v181_v25 = vmax.f32 %v146_v23, 0.0 }
  0xa1   :  { %v195_v26 = vpack.c.bf16 %v181_v25, %v180_v24 }
  0xa3   :  { %572 = vmatmul.msk.bf16.gmra.mxu1 %vm222_vm1, %v195_v26 }
  0xa4   :  { %v148_v27 = vpop.f32.mrf.mxu0 }
  0xa5   :  { %v149_v28 = vadd.f32 %v750_v13, %v148_v27 }
  0xa7   :  { %v182_v31 = vmax.f32 %v149_v28, 0.0 }
  0xac   :  { %v150_v29 = vpop.f32.mrf.mxu0 }
  0xad   :  { %v151_v30 = vadd.f32 %v750_v13, %v150_v29 }
  0xaf   :  { %v183_v32 = vmax.f32 %v151_v30, 0.0 }
  0xb1   :  { %v196_v33 = vpack.c.bf16 %v183_v32, %v182_v31 }
  0xb3   :  { %573 = vmatmul.msk.bf16.gmra.mxu1 %vm222_vm1, %v196_v33 }
  0xb4   :  { %v153_v34 = vpop.f32.mrf.mxu0 }
  0xb5   :  { %v154_v35 = vadd.f32 %v750_v13, %v153_v34 }
  0xb7   :  { %v184_v38 = vmax.f32 %v154_v35, 0.0 }
  0xbc   :  { %v155_v36 = vpop.f32.mrf.mxu0 }
  0xbd   :  { %v156_v37 = vadd.f32 %v750_v13, %v155_v36 }
  0xbf   :  { %v185_v39 = vmax.f32 %v156_v37, 0.0 }
  0xc1   :  { %v197_v40 = vpack.c.bf16 %v185_v39, %v184_v38 }
  0xc3   :  { %574 = vmatmul.msk.bf16.gmra.mxu1 %vm222_vm1, %v197_v40 }
  0xc4   :  { %v158_v41 = vpop.f32.mrf.mxu0 }
  0xc5   :  { %v159_v42 = vadd.f32 %v750_v13, %v158_v41 }
  0xc7   :  { %v186_v45 = vmax.f32 %v159_v42, 0.0 }
  0xcc   :  { %v160_v43 = vpop.f32.mrf.mxu0 }
  0xcd   :  { %v161_v44 = vadd.f32 %v750_v13, %v160_v43 }
  0xcf   :  { %v187_v46 = vmax.f32 %v161_v44, 0.0 }
  0xd1   :  { %v198_v47 = vpack.c.bf16 %v187_v46, %v186_v45 }
  0xd3   :  { %575 = vmatmul.msk.bf16.gmra.mxu1 %vm222_vm1, %v198_v47 }
  0xd4   :  { %v163_v48 = vpop.f32.mrf.mxu0 }
  0xd5   :  { %v164_v49 = vadd.f32 %v750_v13, %v163_v48 }
  0xd7   :  { %v188_v52 = vmax.f32 %v164_v49, 0.0 }
  0xdc   :  { %v165_v50 = vpop.f32.mrf.mxu0 }
  0xdd   :  { %v166_v51 = vadd.f32 %v750_v13, %v165_v50 }
  0xdf   :  { %v189_v53 = vmax.f32 %v166_v51, 0.0 }
  0xe1   :  { %v199_v54 = vpack.c.bf16 %v189_v53, %v188_v52 }
  0xe3   :  { %576 = vmatmul.msk.bf16.gmra.mxu1 %vm222_vm1, %v199_v54 }
  0xe4   :  { %v168_v55 = vpop.f32.mrf.mxu0 }
  0xe5   :  { %v169_v56 = vadd.f32 %v750_v13, %v168_v55 }
  0xe7   :  { %v190_v60 = vmax.f32 %v169_v56, 0.0 }
  0xec   :  { %v170_v57 = vpop.f32.mrf.mxu0 }
  0xed   :  { %v171_v58 = vadd.f32 %v750_v13, %v170_v57 }
  0xef   :  { %v191_v61 = vmax.f32 %v171_v58, 0.0 }
  0xf1   :  { %v200_v62 = vpack.c.bf16 %v191_v61, %v190_v60 }
  0xf3   :  { %577 = vmatmul.msk.bf16.gmra.mxu1 %vm222_vm1, %v200_v62 }
  0xf4   :  { %v173_v0 = vpop.f32.mrf.mxu0 }
  0xf5   :  { %v174_v3 = vadd.f32 %v750_v13, %v173_v0 }
  0xf7   :  { %v192_v6 = vmax.f32 %v174_v3, 0.0  ;;  %v624_v3 = vld [vmem:[%s826_s6] ss:$0 sm:$0xff] }
  0xfc   :  { %v175_v4 = vpop.f32.mrf.mxu0 }
  0xfd   :  { %v176_v5 = vadd.f32 %v750_v13, %v175_v4 }
  0xff   :  { %v193_v7 = vmax.f32 %v176_v5, 0.0 }
 0x101   :  { %v201_v8 = vpack.c.bf16 %v193_v7, %v192_v6 }
 0x103   :  { %578 = vmatmul.msk.bf16.gmra.mxu1 %vm222_vm1, %v201_v8 }
 0x110   :  { %v256_v9 = vpop.f32.mrf.mxu1 }
 0x111   :  { %v257_v11 = vadd.f32 %v623_v10, %v256_v9 }
 0x113   :  { %v296_v15 = vmax.f32 %v257_v11, 0.0 }
 0x118   :  { %v258_v12 = vpop.f32.mrf.mxu1 }
 0x119   :  { %v259_v14 = vadd.f32 %v623_v10, %v258_v12 }
 0x11b   :  { %v297_v16 = vmax.f32 %v259_v14, 0.0 }
 0x11d   :  { %v312_v17 = vpack.c.bf16 %v297_v16, %v296_v15 }
 0x11f   :  { %595 = vmatmul.msk.bf16.vlgmr.msra.gmra.mxu2 %vm356_vm2, %v312_v17 }
 0x120   :  { %v261_v13 = vpop.f32.mrf.mxu1 }
 0x121   :  { %v262_v18 = vadd.f32 %v623_v10, %v261_v13 }
 0x123   :  { %v298_v21 = vmax.f32 %v262_v18, 0.0 }
 0x128   :  { %v263_v19 = vpop.f32.mrf.mxu1 }
 0x129   :  { %v264_v20 = vadd.f32 %v623_v10, %v263_v19 }
 0x12b   :  { %v299_v22 = vmax.f32 %v264_v20, 0.0 }
 0x12d   :  { %v313_v23 = vpack.c.bf16 %v299_v22, %v298_v21 }
 0x12f   :  { %596 = vmatmul.msk.bf16.gmra.mxu2 %vm356_vm2, %v313_v23 }
 0x130   :  { %v266_v24 = vpop.f32.mrf.mxu1 }
 0x131   :  { %v267_v25 = vadd.f32 %v623_v10, %v266_v24 }
 0x133   :  { %v300_v28 = vmax.f32 %v267_v25, 0.0 }
 0x138   :  { %v268_v26 = vpop.f32.mrf.mxu1 }
 0x139   :  { %v269_v27 = vadd.f32 %v623_v10, %v268_v26 }
 0x13b   :  { %v301_v29 = vmax.f32 %v269_v27, 0.0 }
 0x13d   :  { %v314_v30 = vpack.c.bf16 %v301_v29, %v300_v28 }
 0x13f   :  { %597 = vmatmul.msk.bf16.gmra.mxu2 %vm356_vm2, %v314_v30 }
 0x140   :  { %v271_v31 = vpop.f32.mrf.mxu1 }
 0x141   :  { %v272_v32 = vadd.f32 %v623_v10, %v271_v31 }
 0x143   :  { %v302_v35 = vmax.f32 %v272_v32, 0.0 }
 0x148   :  { %v273_v33 = vpop.f32.mrf.mxu1 }
 0x149   :  { %v274_v34 = vadd.f32 %v623_v10, %v273_v33 }
 0x14b   :  { %v303_v36 = vmax.f32 %v274_v34, 0.0 }
 0x14d   :  { %v315_v37 = vpack.c.bf16 %v303_v36, %v302_v35 }
 0x14f   :  { %598 = vmatmul.msk.bf16.gmra.mxu2 %vm356_vm2, %v315_v37 }
 0x150   :  { %v276_v38 = vpop.f32.mrf.mxu1 }
 0x151   :  { %v277_v39 = vadd.f32 %v623_v10, %v276_v38 }
 0x153   :  { %v304_v42 = vmax.f32 %v277_v39, 0.0 }
 0x158   :  { %v278_v40 = vpop.f32.mrf.mxu1 }
 0x159   :  { %v279_v41 = vadd.f32 %v623_v10, %v278_v40 }
 0x15b   :  { %v305_v43 = vmax.f32 %v279_v41, 0.0 }
 0x15d   :  { %v316_v44 = vpack.c.bf16 %v305_v43, %v304_v42 }
 0x15f   :  { %599 = vmatmul.msk.bf16.gmra.mxu2 %vm356_vm2, %v316_v44 }
 0x160   :  { %v281_v45 = vpop.f32.mrf.mxu1 }
 0x161   :  { %v282_v46 = vadd.f32 %v623_v10, %v281_v45 }
 0x163   :  { %v306_v49 = vmax.f32 %v282_v46, 0.0 }
 0x168   :  { %v283_v47 = vpop.f32.mrf.mxu1 }
 0x169   :  { %v284_v48 = vadd.f32 %v623_v10, %v283_v47 }
 0x16b   :  { %v307_v50 = vmax.f32 %v284_v48, 0.0 }
 0x16d   :  { %v317_v51 = vpack.c.bf16 %v307_v50, %v306_v49 }
 0x16f   :  { %600 = vmatmul.msk.bf16.gmra.mxu2 %vm356_vm2, %v317_v51 }
 0x170   :  { %v286_v52 = vpop.f32.mrf.mxu1 }
 0x171   :  { %v287_v53 = vadd.f32 %v623_v10, %v286_v52 }
 0x173   :  { %v308_v56 = vmax.f32 %v287_v53, 0.0 }
 0x178   :  { %v288_v54 = vpop.f32.mrf.mxu1 }
 0x179   :  { %v289_v55 = vadd.f32 %v623_v10, %v288_v54 }
 0x17b   :  { %v309_v57 = vmax.f32 %v289_v55, 0.0 }
 0x17d   :  { %v318_v58 = vpack.c.bf16 %v309_v57, %v308_v56 }
 0x17f   :  { %601 = vmatmul.msk.bf16.gmra.mxu2 %vm356_vm2, %v318_v58 }
 0x180   :  { %v291_v59 = vpop.f32.mrf.mxu1 }
 0x181   :  { %v292_v60 = vadd.f32 %v623_v10, %v291_v59 }
 0x183   :  { %v310_v63 = vmax.f32 %v292_v60, 0.0 }
 0x188   :  { %v293_v61 = vpop.f32.mrf.mxu1 }
 0x189   :  { %v294_v62 = vadd.f32 %v623_v10, %v293_v61 }
 0x18b   :  { %v311_v0 = vmax.f32 %v294_v62, 0.0 }
 0x18d   :  { %v319_v1 = vpack.c.bf16 %v311_v0, %v310_v63  ;;  %v455_v0 = vld [vmem:[#allocation2] sm:$0x1] }
 0x18f   :  { %602 = vmatmul.msk.bf16.gmra.mxu2 %vm356_vm2, %v319_v1  ;;  %v651_v1 = vmov 0  }
 0x190   :  { %621 = vset.pattern.permute.xlu0 %v651_v1 }
 0x191   :  { %458 = vperm.xlu0 %621, %v455_v0  }
 0x1a2   :  { %v390_v2 = vpop.f32.mrf.mxu2 }
 0x1a3   :  { %v391_v4 = vadd.f32 %v624_v3, %v390_v2 }
 0x1a5   :  { %v430_v7 = vmax.f32 %v391_v4, 0.0 }
 0x1aa   :  { %v392_v5 = vpop.f32.mrf.mxu2 }
 0x1ab   :  { %v393_v6 = vadd.f32 %v624_v3, %v392_v5  ;;  %v454_v5 = vld [vmem:[%s827_s7] sm:$0x1] }
 0x1ad   :  { %v431_v8 = vmax.f32 %v393_v6, 0.0 }
 0x1af   :  { %v802_v9 = vpack.c.bf16 %v431_v8, %v430_v7 }
 0x1b1   :  { %v466_v4 = vsel %vm104_vm0, %v802_v9, 0 }
 0x1b2   :  { %v395_v11 = vpop.f32.mrf.mxu2 }
 0x1b3   :  { %v396_v12 = vadd.f32 %v624_v3, %v395_v11 }
 0x1b5   :  { %v432_v15 = vmax.f32 %v396_v12, 0.0 }
 0x1ba   :  { %v397_v10 = vpop.f32.mrf.mxu2 }
 0x1bb   :  { %v398_v14 = vadd.f32 %v624_v3, %v397_v10 }
 0x1bd   :  { %v433_v16 = vmax.f32 %v398_v14, 0.0 }
 0x1bf   :  { %v447_v17 = vpack.c.bf16 %v433_v16, %v432_v15 }
 0x1c2   :  { %v400_v13 = vpop.f32.mrf.mxu2 }
 0x1c3   :  { %v401_v18 = vadd.f32 %v624_v3, %v400_v13 }
 0x1c5   :  { %v434_v21 = vmax.f32 %v401_v18, 0.0 }
 0x1ca   :  { %v402_v19 = vpop.f32.mrf.mxu2 }
 0x1cb   :  { %v403_v20 = vadd.f32 %v624_v3, %v402_v19 }
 0x1cd   :  { %v435_v22 = vmax.f32 %v403_v20, 0.0 }
 0x1cf   :  { %v448_v23 = vpack.c.bf16 %v435_v22, %v434_v21 }
 0x1d1   :  { %v472_v2 = vsel %vm104_vm0, %v448_v23, 0 }
 0x1d2   :  { %v405_v24 = vpop.f32.mrf.mxu2 }
 0x1d3   :  { %v406_v25 = vadd.f32 %v624_v3, %v405_v24 }
 0x1d5   :  { %v436_v28 = vmax.f32 %v406_v25, 0.0 }
 0x1da   :  { %v407_v26 = vpop.f32.mrf.mxu2 }
 0x1db   :  { %v408_v27 = vadd.f32 %v624_v3, %v407_v26 }
 0x1dd   :  { %v437_v29 = vmax.f32 %v408_v27, 0.0 }
 0x1df   :  { %v449_v30 = vpack.c.bf16 %v437_v29, %v436_v28 }
 0x1e1   :  { %v475_v63 = vsel %vm104_vm0, %v449_v30, 0 }
 0x1e2   :  { %v410_v31 = vpop.f32.mrf.mxu2 }
 0x1e3   :  { %v411_v32 = vadd.f32 %v624_v3, %v410_v31 }
 0x1e5   :  { %v438_v35 = vmax.f32 %v411_v32, 0.0 }
 0x1ea   :  { %v412_v33 = vpop.f32.mrf.mxu2 }
 0x1eb   :  { %v413_v34 = vadd.f32 %v624_v3, %v412_v33 }
 0x1ed   :  { %v439_v36 = vmax.f32 %v413_v34, 0.0 }
 0x1ef   :  { %v450_v37 = vpack.c.bf16 %v439_v36, %v438_v35 }
 0x1f1   :  { %v478_v62 = vsel %vm104_vm0, %v450_v37, 0 }
 0x1f2   :  { %v415_v38 = vpop.f32.mrf.mxu2 }
 0x1f3   :  { %v416_v56 = vadd.f32 %v624_v3, %v415_v38 }
 0x1f5   :  { %v440_v59 = vmax.f32 %v416_v56, 0.0 }
 0x1fa   :  { %v417_v39 = vpop.f32.mrf.mxu2 }
 0x1fb   :  { %v418_v54 = vadd.f32 %v624_v3, %v417_v39 }
 0x1fd   :  { %v441_v57 = vmax.f32 %v418_v54, 0.0 }
 0x1ff   :  { %v451_v60 = vpack.c.bf16 %v441_v57, %v440_v59 }
 0x201   :  { %v481_v61 = vsel %vm104_vm0, %v451_v60, 0 }
 0x202   :  { %v420_v40 = vpop.f32.mrf.mxu2 }
 0x203   :  { %v421_v49 = vadd.f32 %v624_v3, %v420_v40  ;;  %v459_v6 = vpop.permute.xlu0 %458 }
 0x204   :  { %v461_v7 = vperm.slane %v459_v6, 0 }
 0x205   :  { %v442_v53 = vmax.f32 %v421_v49, 0.0 }
 0x20a   :  { %v422_v41 = vpop.f32.mrf.mxu2 }
 0x20b   :  { %v423_v46 = vadd.f32 %v624_v3, %v422_v41 }
 0x20d   :  { %v443_v51 = vmax.f32 %v423_v46, 0.0 }
 0x20f   :  { %v452_v55 = vpack.c.bf16 %v443_v51, %v442_v53 }
 0x211   :  { %v484_v58 = vsel %vm104_vm0, %v452_v55, 0 }
 0x212   :  { %v425_v42 = vpop.f32.mrf.mxu2 }
 0x213   :  { %v426_v43 = vadd.f32 %v624_v3, %v425_v42 }
 0x215   :  { %v444_v47 = vmax.f32 %v426_v43, 0.0 }
 0x21a   :  { %v427_v44 = vpop.f32.mrf.mxu2 }
 0x21b   :  { %v428_v45 = vadd.f32 %v624_v3, %v427_v44  ;;  %v469_v3 = vsel %vm104_vm0, %v447_v17, 0 }
 0x21d   :  { %v445_v48 = vmax.f32 %v428_v45, 0.0 }
 0x21f   :  { %v453_v50 = vpack.c.bf16 %v445_v48, %v444_v47 }
 0x221   :  { %v487_v52 = vsel %vm104_vm0, %v453_v50, 0 }
 0x222   :  { %489 = vmatpush.bf16.xpose.msra.mxu3 %v487_v52 }
 0x22a   :  { %490 = vmatpush.bf16.xpose.msra.mxu3 %v484_v58 }
 0x232   :  { %491 = vmatpush.bf16.xpose.msra.mxu3 %v481_v61 }
 0x23a   :  { %492 = vmatpush.bf16.xpose.msra.mxu3 %v478_v62 }
 0x242   :  { %493 = vmatpush.bf16.xpose.msra.mxu3 %v475_v63 }
 0x24a   :  { %494 = vmatpush.bf16.xpose.msra.mxu3 %v472_v2 }
 0x252   :  { %495 = vmatpush.bf16.xpose.msra.mxu3 %v469_v3 }
 0x25a   :  { %496 = vmatpush.bf16.xpose.msra.mxu3 %v466_v4 }
 0x261   :  { %603 = vmatmul.msk.bf16.vlgmr.msra.gmra.mxu3 %vm104_vm0, %v454_v5 }
 0x2e4   :  { %v498_v8 = vpop.f32.mrf.mxu3 }
 0x2e5   :  { %v499_v11 = vadd.f32 %v498_v8, %v461_v7 }
 0x2e7   :  { %502 = vst [vmem:[#allocation3] sm:$0x1] %v499_v11 }
 0x2e8   :  { %513 = dma.vmem_to_hbm [thread:$0]  %s509_s19, 16, %s511_s22, [#allocation4]  }
 0x2ec   :  { %v500_v9 = vpop.f32.mrf.mxu3 }
 0x2ed   :  { %649 = dma.done.wait [#allocation4], 16  }
 0x2ee   :  { %650 = vsyncadd [#allocation4], 4294967280 }
 0x2ef   :  { %518 = vsyncpa [#allocation4], 1 }

</bundles_post_ra>
